<compile_context>
chip_gen: v7x
topology: tpu7x:2x2x1
jax: 0.10.0
libtpu: 0.0.40
codegen_flags: <defaults>
</compile_context>

<pallas_src>
import itertools
import jax
import jax.numpy as jnp
from jax.experimental import pallas as pl
from jax.experimental.pallas import tpu as pltpu

# ---- small config consistent with Flat_Morphic_module(input_size=(16,16), output_size=(16,16),
# ----                                                  num_sinapse=3, window_width=1), batch=2
H, W = 16, 16
P = H * W                 # 256 -> lane-dense (multiple of 128)
NUM_SINAPSE = 3
WINDOW_WIDTH = 1
BATCH = 2
TILE_B_MAX = 256          # full MXU M-tile on v6e/v7x; use 128 if tuning specifically for v5e


# ----------------------------------------------------------------------------------
# Parameter-only precomputation (glue, plain JAX): reproduces the PyTorch coordinate
# math exactly, including the reuse of the trailing loop variable `dim` in `activation`
# (base "decard" coordinates use size[-1] for *both* axes).
# ----------------------------------------------------------------------------------
def to_decard_idx(angle, size):
    a = jnp.arcsin(jnp.sin(angle))
    b = jnp.cos(angle)
    c = (1.0 - jnp.sin(angle) ** 2 + 1e-6) ** 0.5
    f = a * b / c
    f = 2.0 * f / jnp.pi
    f = (f + 1.0) / 2.0
    f = f * (size - 1)
    return f


def give_window(window_width, num_dim):
    d = [list(range(-window_width, window_width + 1)) for _ in range(num_dim)]
    return list(itertools.product(*d))


def coords_to_indices(coords, sizes, ww):
    """coords: tuple of 2 angle arrays (S,H,W); sizes: (H, W). Returns rh, rw (int32), src."""
    deltas = give_window(ww, 2)
    idx_list = []
    for dim in range(2):
        cols = []
        for delta in deltas:
            dangle = coords[dim] + jnp.pi * delta[dim] / (sizes[dim] - 1)
            dec = to_decard_idx(dangle, sizes[dim])
            cols.append(jnp.round(dec).astype(jnp.int32))
        idx_list.append(jnp.stack(cols, axis=-1))  # (S,H,W,K)
    rh, rw = idx_list
    # NOTE: reproduces the PyTorch quirk — both base decard coords use sizes[-1].
    d0 = to_decard_idx(coords[0], sizes[-1])
    d1 = to_decard_idx(coords[1], sizes[-1])
    src = jnp.sqrt((rh.astype(jnp.float32) - d0[..., None]) ** 2
                   + (rw.astype(jnp.float32) - d1[..., None]) ** 2)
    src = 6.0 * (ww - 2.0 * src) / ww
    src = 1.0 / (1.0 + jnp.exp(-src))
    return rh, rw, src


def _pos_grid(S, Hs, Ws, K):
    p = jnp.arange(Hs)[:, None] * Ws + jnp.arange(Ws)[None, :]
    return jnp.broadcast_to(p[None, :, :, None], (S, Hs, Ws, K))


def build_dendrite_matrix(Wd, rh, rw, src):
    # DL_out[b, h, w] = sum_{s,k} Wd[s,h,w]*src[s,h,w,k] * x[b, rh, rw]  =>  M_D @ x_flat
    S, Hs, Ws, K = rh.shape
    coeff = Wd[..., None] * src
    p_full = _pos_grid(S, Hs, Ws, K)
    q_full = rh * Ws + rw
    M = jnp.zeros((Hs * Ws, Hs * Ws), jnp.float32)
    return M.at[p_full.ravel(), q_full.ravel()].add(coeff.ravel())


def build_axon_matrix(Wa, rh, rw, src):
    # AL_out[b, rh, rw] += Wa[s,h,w]*src[s,h,w,k] * x[b, h, w]  =>  M_A @ x_flat
    S, Hs, Ws, K = rh.shape
    coeff = Wa[..., None] * src
    p_full = _pos_grid(S, Hs, Ws, K)
    q_full = rh * Ws + rw
    M = jnp.zeros((Hs * Ws, Hs * Ws), jnp.float32)
    return M.at[q_full.ravel(), p_full.ravel()].add(coeff.ravel())


# ----------------------------------------------------------------------------------
# Pallas kernel: the input-dependent hot path — one (tile_b, P) x (P, P) bf16 matmul per
# batch tile on the MXU, accumulated in f32.
# ----------------------------------------------------------------------------------
def flat_morphic_kernel(x_ref, mt_ref, o_ref):
    # x_ref : (tile_b, P) bf16  flattened input tile
    # mt_ref: (P, P)     bf16  combined (Dendrite + Axon) operator, transposed
    # o_ref : (tile_b, P) f32  flattened output tile (lane-dense: P % 128 == 0)
    o_ref[...] = jnp.dot(x_ref[...], mt_ref[...], preferred_element_type=jnp.float32)


@jax.jit
def flat_morphic_forward(x_nchw, mt_bf16):
    B = x_nchw.shape[0]
    x_flat = x_nchw.reshape(B, P).astype(jnp.bfloat16)   # squeeze C=1, flatten (H,W), bf16 feed

    # Whole-batch block when it fits (block dims equal to array dims are always legal,
    # no pad/slice copies); otherwise 256-row tiles — Pallas masks the ragged last tile,
    # which is safe because each output row depends only on the same input row.
    tile_b = B if B <= TILE_B_MAX else TILE_B_MAX
    n_tiles = pl.cdiv(B, tile_b)

    cost = pl.CostEstimate(flops=2 * B * P * P,
                           transcendentals=0,
                           bytes_accessed=2 * B * P + 2 * P * P + 4 * B * P)

    y = pl.pallas_call(
        flat_morphic_kernel,
        out_shape=jax.ShapeDtypeStruct((B, P), jnp.float32),
        grid_spec=pltpu.PrefetchScalarGridSpec(
            num_scalar_prefetch=0,
            grid=(n_tiles,),
            in_specs=[pl.BlockSpec((tile_b, P), lambda i: (i, 0)),
                      # constant block index -> operator stays resident, not re-DMA'd per step
                      pl.BlockSpec((P, P), lambda i: (0, 0))],
            out_specs=pl.BlockSpec((tile_b, P), lambda i: (i, 0))),
        compiler_params=pltpu.CompilerParams(
            dimension_semantics=("parallel",)),
        cost_estimate=cost,
    )(x_flat, mt_bf16)

    return y.reshape(B, 1, H, W)                         # unsqueeze channel dim back


# ----------------------------------------------------------------------------------
# Pure-JAX reference using the *direct* gather / scatter-add semantics, for validation.
# ----------------------------------------------------------------------------------
def flat_morphic_ref(x_nchw, Wd, rh_d, rw_d, src_d, Wa, rh_a, rw_a, src_a):
    x = x_nchw[:, 0]                                                   # (B,H,W)
    B = x.shape[0]
    # Dendrite: gather + weighted reduction over (synapse, window)
    gath = x[:, rh_d, rw_d]                                            # (B,S,H,W,K)
    dl = (gath * Wd[None, ..., None] * src_d[None]).sum(axis=(1, 4))   # (B,H,W)
    # Axon: weighted scatter-add (index_put accumulate=True)
    contrib = x[:, None, :, :, None] * Wa[None, ..., None] * src_a[None]
    bidx = jnp.broadcast_to(jnp.arange(B)[:, None, None, None, None], contrib.shape)
    rh_b = jnp.broadcast_to(rh_a[None], contrib.shape)
    rw_b = jnp.broadcast_to(rw_a[None], contrib.shape)
    al = jnp.zeros_like(x).at[bidx, rh_b, rw_b].add(contrib)
    return (dl + al)[:, None]                                          # (B,1,H,W)


# ----------------------------------------------------------------------------------
def init_params(key):
    key, *ks = jax.random.split(key, 7)
    Wd = jax.random.uniform(ks[0], (NUM_SINAPSE, H, W), jnp.float32, -1.0, 1.0)
    cd = (jax.random.uniform(ks[1], (NUM_SINAPSE, H, W), jnp.float32, 0.0, jnp.pi),
          jax.random.uniform(ks[2], (NUM_SINAPSE, H, W), jnp.float32, 0.0, jnp.pi))
    Wa = jax.random.uniform(ks[3], (NUM_SINAPSE, H, W), jnp.float32, -1.0, 1.0)
    ca = (jax.random.uniform(ks[4], (NUM_SINAPSE, H, W), jnp.float32, 0.0, jnp.pi),
          jax.random.uniform(ks[5], (NUM_SINAPSE, H, W), jnp.float32, 0.0, jnp.pi))
    return (Wd, cd, Wa, ca), key


if __name__ == "__main__":
    key = jax.random.PRNGKey(0)
    (Wd, cd, Wa, ca), key = init_params(key)

    sizes = (H, W)
    # Dendrite coords scale by input_size, Axon coords by output_size (equal here).
    rh_d, rw_d, src_d = coords_to_indices(cd, sizes, WINDOW_WIDTH)
    rh_a, rw_a, src_a = coords_to_indices(ca, sizes, WINDOW_WIDTH)
    M = build_dendrite_matrix(Wd, rh_d, rw_d, src_d) + build_axon_matrix(Wa, rh_a, rw_a, src_a)
    # Kernel computes y = x @ M.T; default MXU precision truncates to bf16 anyway, so feed bf16
    # to halve the operator DMA / VMEM footprint with no additional accuracy loss.
    mt_bf16 = M.T.astype(jnp.bfloat16)

    key, kx = jax.random.split(key)
    x = jax.random.uniform(kx, (BATCH, 1, H, W), jnp.float32)  # NCHW input, channel = 1

    out = flat_morphic_forward(x, mt_bf16)
    out = jax.block_until_ready(out)

    ref = flat_morphic_ref(x, Wd, rh_d, rw_d, src_d, Wa, rh_a, rw_a, src_a)
    assert out.shape == (BATCH, 1, H, W)
    # bf16 operands + f32 accumulation (same error class as default-precision f32 operands),
    # so compare against the exact-f32 reference with a bf16-operand-level tolerance.
    rel = jnp.linalg.norm(out - ref) / jnp.linalg.norm(ref)
    assert rel < 1e-2, rel
    assert jnp.allclose(out, ref, atol=1e-1, rtol=1e-1), (out, ref)

    print("KERNEL_OK")
</pallas_src>

<mosaic_0001>
module attributes {stable_mosaic.version = 11 : i64} {
  func.func @flat_morphic_kernel(%arg0: i32, %arg1: memref<2x256xbf16, #tpu.memory_space<vmem>>, %arg2: memref<256x256xbf16, #tpu.memory_space<vmem>>, %arg3: memref<2x256xf32, #tpu.memory_space<vmem>>) attributes {dimension_semantics = [#tpu.dimension_semantics<parallel>], iteration_bounds = array<i64: 1>, scalar_prefetch = 0 : i64, scratch_operands = 0 : i64, tpu.core_type = #tpu.core_type<tc>, window_params = [{transform_indices = @transform_0, window_bounds = array<i64: 2, 256>}, {pipeline_mode = #tpu.pipeline_mode<synchronous>, transform_indices = @transform_1, window_bounds = array<i64: 256, 256>}, {transform_indices = @transform_2, window_bounds = array<i64: 2, 256>}]} {
    %c0 = arith.constant 0 : index
    %c0_0 = arith.constant 0 : index
    %0 = vector.load %arg1[%c0, %c0_0] : memref<2x256xbf16, #tpu.memory_space<vmem>>, vector<2x256xbf16>
    %c0_1 = arith.constant 0 : index
    %c0_2 = arith.constant 0 : index
    %1 = vector.load %arg2[%c0_1, %c0_2] : memref<256x256xbf16, #tpu.memory_space<vmem>>, vector<256x256xbf16>
    %cst = arith.constant dense<0.000000e+00> : vector<2x256xf32>
    %2 = tpu.matmul %0, %1, %cst {dimension_numbers = #tpu.dot_dimension_numbers<[1], [0], [0], [1], [0, 0, 1, 1], [], []>} : vector<2x256xbf16>, vector<256x256xbf16>, vector<2x256xf32> -> vector<2x256xf32>
    %c0_3 = arith.constant 0 : index
    %c0_4 = arith.constant 0 : index
    %3 = vector.load %arg3[%c0_3, %c0_4] : memref<2x256xf32, #tpu.memory_space<vmem>>, vector<2x256xf32>
    tpu.vector_store %arg3[%c0_3, %c0_4], %2 {strides = array<i32>} : memref<2x256xf32, #tpu.memory_space<vmem>>, vector<2x256xf32>,
    return
  }
  func.func @transform_0(%arg0: i32) -> (i32, i32) {
    %c0_i32 = arith.constant 0 : i32
    %c0_i32_0 = arith.constant 0 : i32
    return %arg0, %c0_i32 : i32, i32
  }
  func.func @transform_1(%arg0: i32) -> (i32, i32) {
    %c0_i32 = arith.constant 0 : i32
    %c0_i32_0 = arith.constant 0 : i32
    %c0_i32_1 = arith.constant 0 : i32
    return %c0_i32, %c0_i32_0 : i32, i32
  }
  func.func @transform_2(%arg0: i32) -> (i32, i32) {
    %c0_i32 = arith.constant 0 : i32
    %c0_i32_0 = arith.constant 0 : i32
    return %arg0, %c0_i32 : i32, i32
  }
}

</mosaic_0001>

<bundles_post_ra>
// kernel: flat_morphic_forward.1
= control target key start
LH: loop header
LB: loop body
LE: loop exit
PB: predicated region body
PF: predicated region fallthrough
CT: control target
= control target key end

     0   :  { %7 = vsyncpa [#allocation3], 0  ;;  %s411_s9 = smov [#allocation2]   ;;  %s448_s0 = inlined_call_operand.vmem [shape: bf16[2,256], index: 0, kind: input, shape index: {}]   ;;  %s449_s1 = inlined_call_operand.hbm [shape: bf16[256,256], index: 1, kind: input, shape index: {}]   ;;  %s450_s2 = inlined_call_operand.vmem [shape: f32[2,256], index: 2, kind: output, shape index: {}]  }
   0x1   :  { %s15_s10 = sshll.u32 %s411_s9, 4  ;;  %s387_s13 = scalar_lea.hbm %s449_s1, 4096  ;;  %s16_s10 = int_to_ptr.vmem [resolvable:$true] %s15_s10 }
   0x2   :  { %p388_p0 = scmp.ne.s32.totalorder %s449_s1, %s387_s13  ;;  %p391_p1 = scmp.lt.u32.totalorder %s387_s13, %s449_s1 }
   0x4   :  { %p393_p2 = pnand %p391_p1, %p388_p0 }
   0x6   :  { %396 = shalt.err (!%p393_p2)
}
   0x7   :  { %s397_s18 = scalar_lea.vmem %s16_s10, 4096  ;;  %p402_p4 = scmp.lt.s32.totalorder %s16_s10, %s16_s10 }
   0x8   :  { %p398_p3 = scmp.ne.s32.totalorder %s16_s10, %s397_s18  ;;  %p403_p5 = scmp.lt.s32.totalorder %s397_s18, %s397_s18 }
   0xa   :  { %p404_p6 = por %p403_p5, %p402_p4 }
   0xc   :  { %p405_p7 = pnand %p404_p6, %p398_p3 }
   0xe   :  { %408 = shalt.err (!%p405_p7)
}
   0xf   :  { %s412_s19 = smov 128   ;;  %s413_s20 = smov 8  }
  0x10   :  { %21 = dma.hbm_to_vmem [thread:$0]  %s449_s1, 4096, %s16_s10, [#allocation3], %s412_s19, %s412_s19, %s413_s20  }
  0x11   :  { %409 = dma.done.wait [#allocation3], 4096  }
  0x12   :  { %410 = vsyncadd [#allocation3], 4294963200  ;;  %v339_v0 = vld [vmem:[#allocation2 + $0x4] ss:$8 sps:$4 sm:$0xff]   ;;  %v341_v1 = vld [vmem:[#allocation2] ss:$8 sps:$4 sm:$0xff]   ;;  %v70_v11 = vlaneseq }
  0x13   :  { %243 = vmatprep.subr.bf16.mxu0 %v339_v0  ;;  %v342_v2 = vld [vmem:[#allocation2 + $0x14] ss:$8 sps:$4 sm:$0xff]   ;;  %v344_v3 = vld [vmem:[#allocation2 + $0x10] ss:$8 sps:$4 sm:$0xff]   ;;  %v345_v4 = vld [vmem:[#allocation2 + $0x24] ss:$8 sps:$4 sm:$0xff]  }
  0x14   :  { %244 = vmatpush1.bf16.msra.mxu0 %v341_v1  ;;  %v347_v5 = vld [vmem:[#allocation2 + $0x20] ss:$8 sps:$4 sm:$0xff]   ;;  %v348_v6 = vld [vmem:[#allocation2 + $0x34] ss:$8 sps:$4 sm:$0xff]   ;;  %v350_v7 = vld [vmem:[#allocation2 + $0x30] ss:$8 sps:$4 sm:$0xff]  }
  0x15   :  { %245 = vmatprep.subr.bf16.mxu0 %v342_v2  ;;  %v351_v8 = vld [vmem:[#allocation2 + $0x44] ss:$8 sps:$4 sm:$0xff]   ;;  %v414_v9 = vmov 1966171168   ;;  %v353_v12 = vld [vmem:[#allocation2 + $0x40] ss:$8 sps:$4 sm:$0xff]  }
  0x16   :  { %v68_v10 = vunpack.c.l.s4 %v414_v9  ;;  %v354_v13 = vld [vmem:[#allocation2 + $0x54] ss:$8 sps:$4 sm:$0xff]   ;;  %v71_v15 = vshrl.u32 %v70_v11, 7  ;;  %v356_v16 = vld [vmem:[#allocation2 + $0x50] ss:$8 sps:$4 sm:$0xff]  }
  0x17   :  { %v357_v17 = vld [vmem:[#allocation2 + $0x64] ss:$8 sps:$4 sm:$0xff]   ;;  %v301_v19 = vld.sshfl [vmem:[%s448_s0] sm:$0x11 pattern:$0x75316420] }
  0x18   :  { %246 = vmatpush1.bf16.msra.mxu0 %v344_v3  ;;  %v69_v14 = vunpack.c.0.s8 %v68_v10  ;;  %v66_v20 = vcombine.high %v301_v19, %v301_v19  ;;  %v359_v21 = vld [vmem:[#allocation2 + $0x60] ss:$8 sps:$4 sm:$0xff]   ;;  %v360_v22 = vld [vmem:[#allocation2 + $0x74] ss:$8 sps:$4 sm:$0xff]   ;;  %v362_v24 = vld [vmem:[#allocation2 + $0x70] ss:$8 sps:$4 sm:$0xff]  }
  0x19   :  { %247 = vmatprep.subr.bf16.mxu0 %v345_v4  ;;  %v363_v25 = vld [vmem:[#allocation2 + $0x84] ss:$8 sps:$4 sm:$0xff]   ;;  %v365_v26 = vld [vmem:[#allocation2 + $0x80] ss:$8 sps:$4 sm:$0xff]   ;;  %v366_v27 = vld [vmem:[#allocation2 + $0x94] ss:$8 sps:$4 sm:$0xff]  }
  0x1a   :  { %v72_v18 = vsub.s32 %v69_v14, %v71_v15  ;;  %v368_v28 = vld [vmem:[#allocation2 + $0x90] ss:$8 sps:$4 sm:$0xff]   ;;  %v369_v29 = vld [vmem:[#allocation2 + $0xa4] ss:$8 sps:$4 sm:$0xff]   ;;  %v371_v30 = vld [vmem:[#allocation2 + $0xa0] ss:$8 sps:$4 sm:$0xff]  }
  0x1b   :  { %v372_v31 = vld [vmem:[#allocation2 + $0xb4] ss:$8 sps:$4 sm:$0xff]   ;;  %v374_v32 = vld [vmem:[#allocation2 + $0xb0] ss:$8 sps:$4 sm:$0xff]   ;;  %v375_v33 = vld [vmem:[#allocation2 + $0xc4] ss:$8 sps:$4 sm:$0xff]  }
  0x1c   :  { %248 = vmatpush1.bf16.msra.mxu0 %v347_v5  ;;  %v80_v23 = vrot.slane %v66_v20, %v72_v18  ;;  %v377_v34 = vld [vmem:[#allocation2 + $0xc0] ss:$8 sps:$4 sm:$0xff]   ;;  %v378_v35 = vld [vmem:[#allocation2 + $0xd4] ss:$8 sps:$4 sm:$0xff]   ;;  %v380_v36 = vld [vmem:[#allocation2 + $0xd0] ss:$8 sps:$4 sm:$0xff]   ;;  %v73_v41 = vrot.slane %v301_v19, %v72_v18 }
  0x1d   :  { %249 = vmatprep.subr.bf16.mxu0 %v348_v6  ;;  %v381_v37 = vld [vmem:[#allocation2 + $0xe4] ss:$8 sps:$4 sm:$0xff]   ;;  %v383_v38 = vld [vmem:[#allocation2 + $0xe0] ss:$8 sps:$4 sm:$0xff]   ;;  %v384_v39 = vld [vmem:[#allocation2 + $0xf4] ss:$8 sps:$4 sm:$0xff]  }
  0x1e   :  { %275 = vmatprep.mubr.bf16.mxu0 %v80_v23  ;;  %v386_v40 = vld [vmem:[#allocation2 + $0xf0] ss:$8 sps:$4 sm:$0xff]  }
  0x20   :  { %250 = vmatpush1.bf16.msra.mxu0 %v350_v7 }
  0x21   :  { %251 = vmatprep.subr.bf16.mxu0 %v351_v8 }
  0x24   :  { %252 = vmatpush1.bf16.msra.mxu0 %v353_v12 }
  0x25   :  { %253 = vmatprep.subr.bf16.mxu0 %v354_v13 }
  0x28   :  { %254 = vmatpush1.bf16.msra.mxu0 %v356_v16 }
  0x29   :  { %255 = vmatprep.subr.bf16.mxu0 %v357_v17 }
  0x2c   :  { %256 = vmatpush1.bf16.msra.mxu0 %v359_v21 }
  0x2d   :  { %257 = vmatprep.subr.bf16.mxu0 %v360_v22 }
  0x30   :  { %258 = vmatpush1.bf16.msra.mxu0 %v362_v24 }
  0x31   :  { %259 = vmatprep.subr.bf16.mxu0 %v363_v25 }
  0x34   :  { %260 = vmatpush1.bf16.msra.mxu0 %v365_v26 }
  0x35   :  { %261 = vmatprep.subr.bf16.mxu0 %v366_v27 }
  0x38   :  { %262 = vmatpush1.bf16.msra.mxu0 %v368_v28 }
  0x39   :  { %263 = vmatprep.subr.bf16.mxu0 %v369_v29 }
  0x3c   :  { %264 = vmatpush1.bf16.msra.mxu0 %v371_v30 }
  0x3d   :  { %265 = vmatprep.subr.bf16.mxu0 %v372_v31 }
  0x40   :  { %266 = vmatpush1.bf16.msra.mxu0 %v374_v32 }
  0x41   :  { %267 = vmatprep.subr.bf16.mxu0 %v375_v33 }
  0x44   :  { %268 = vmatpush1.bf16.msra.mxu0 %v377_v34 }
  0x45   :  { %269 = vmatprep.subr.bf16.mxu0 %v378_v35 }
  0x48   :  { %270 = vmatpush1.bf16.msra.mxu0 %v380_v36 }
  0x49   :  { %271 = vmatprep.subr.bf16.mxu0 %v381_v37 }
  0x4c   :  { %272 = vmatpush1.bf16.msra.mxu0 %v383_v38 }
  0x4d   :  { %273 = vmatprep.subr.bf16.mxu0 %v384_v39 }
  0x50   :  { %274 = vmatpush1.bf16.msra.mxu0 %v386_v40 }
  0x53   :  { %276 = vmatmul.mubr.bf16.vlgmr.msra.gmra.mrb[0].mxu0 %v73_v41 }
 0x126   :  { %v277_v42 = vpop.f32.mrb[0].mxu0 }
 0x127   :  { %v279_v43 = vpop.f32.mrb[1].mxu0 }
 0x128   :  { %v286_v44 = vcombine.low %v277_v42, %v279_v43  ;;  %v281_v45 = vpop.f32.mrb[2].mxu0 }
 0x129   :  { %v282_v46 = vpop.f32.mrb[3].mxu0 }
 0x12a   :  { %334 = vst.sshfl [vmem:[%s450_s2] sm:$0x33 pattern:$0x76325410] %v286_v44 }
 0x12b   :  { %300 = vsyncpa [#allocation3], 1 }

</bundles_post_ra>
